<compile_context>
chip_gen: v5e
topology: v5e:2x2
jax: 0.10.0
libtpu: 0.0.40
codegen_flags: <defaults>
</compile_context>

<pallas_src>
import functools

import jax
import jax.numpy as jnp
from jax.experimental import pallas as pl
from jax.experimental.pallas import tpu as pltpu

COSINE_SCALE = 20.0  # stand-in for const.COSINE_SCALE


def _round_up(v: int, m: int) -> int:
    return (v + m - 1) // m * m


def _cdiv(a: int, b: int) -> int:
    return -(-a // b)


def _vmem_budget_bytes():
    """(vmem_limit_bytes for CompilerParams, usable per-kernel budget)."""
    phys = 64 << 20  # conservative fallback = v7x per-TC VMEM
    try:
        info = pltpu.get_tpu_info()
        phys = int(getattr(info, "vmem_capacity_bytes", phys))
    except Exception:
        pass
    limit = min(phys, 128 << 20)          # 128 MiB on v5e/v6e, 64 MiB on v7x
    budget = max(8 << 20, limit - (6 << 20))  # headroom for internal scratch
    return limit, budget


def _resident_spec(shape):
    """BlockSpec for a grid-invariant operand; single-buffered if supported."""
    index_map = lambda *_: (0,) * len(shape)
    try:
        return pl.BlockSpec(shape, index_map, pipeline_mode=pl.Buffered(1))
    except TypeError:  # older jax without pipeline_mode kwarg
        return pl.BlockSpec(shape, index_map)


def _cosine_predictor_kernel(x_ref, wc_ref, wb_ref, bias_ref,
                             scores_ref, bbox_ref, *, compute_dtype):
    x = x_ref[...]                                          # (tb, C) f32

    # Exact f32 row norm BEFORE the bf16 cast.
    ss = jnp.sum(x * x, axis=1, keepdims=True)              # (tb, 1)
    inv = pl.reciprocal(jnp.sqrt(ss) + 1e-5, approx=False)  # (tb, 1)
    # TODO(synk): flip approx=True (EUP slot) if a bundle dump shows VALU
    # pressure; numerics are already bf16-dominated.

    xb = x.astype(compute_dtype)                            # bf16 for native MXU

    # Classifier columns already hold scale * Wc / (||Wc|| + 1e-5); applying the
    # per-row 1/(||x||+1e-5) after the dot is algebraically exact.
    cls = jnp.dot(xb, wc_ref[...], preferred_element_type=jnp.float32)
    scores_ref[...] = cls * inv                             # lane-dense, unmasked

    bb = jnp.dot(xb, wb_ref[...], preferred_element_type=jnp.float32)
    bbox_ref[...] = bb + bias_ref[...]                      # lane-dense, unmasked


def prepare_cosine_predictor_params(cls_weight, bbox_weight, bbox_bias, scale,
                                    compute_dtype=jnp.bfloat16):
    """Static weight prep, hoisted out of the forward path.

    Call once per (weights, scale) and reuse across forward calls.  NOTE: the
    folded classifier slab depends on `scale`; if `scale` changes, re-run this
    (do not cache across a changed scale).
    """
    cls_weight = cls_weight.astype(jnp.float32)
    bbox_weight = bbox_weight.astype(jnp.float32)
    n_cls, in_channels = cls_weight.shape
    n_bbox = bbox_weight.shape[0]

    # Row-normalize classifier weight (matches torch's in-place .data div) and
    # fold the scalar cosine scale into it (exact).
    w_norm = jnp.sqrt(jnp.sum(cls_weight * cls_weight, axis=1, keepdims=True))
    cls_w_scaled = jnp.asarray(scale, jnp.float32) * cls_weight / (w_norm + 1e-5)

    ncls_pad = _round_up(n_cls, 128)
    nbbox_pad = _round_up(n_bbox, 128)

    # Pre-transposed (C, n_pad) slabs so the MXU contracts on x's last dim with
    # no in-kernel transpose; cast to bf16 once here (not per call).
    wc = jnp.pad(cls_w_scaled.T, ((0, 0), (0, ncls_pad - n_cls))).astype(compute_dtype)
    wb = jnp.pad(bbox_weight.T, ((0, 0), (0, nbbox_pad - n_bbox))).astype(compute_dtype)
    bias = jnp.pad(bbox_bias.astype(jnp.float32),
                   (0, nbbox_pad - n_bbox)).reshape(1, nbbox_pad)

    return dict(wc=wc, wb=wb, bias=bias, n_cls=n_cls, n_bbox=n_bbox,
                in_channels=in_channels, compute_dtype=compute_dtype)


def cosine_similarity_predictor_forward(x, params):
    """Forward pass with pre-prepared params (see prepare_cosine_predictor_params)."""
    if x.ndim == 4:
        assert x.shape[2:] == (1, 1), (
            f"x has the wrong shape, expecting the last two dimensions to be "
            f"[1,1] instead of {list(x.shape[2:])}")
    x2d = x.reshape(x.shape[0], -1).astype(jnp.float32)      # flatten(1)
    B, C = x2d.shape
    assert C == params["in_channels"]

    wc, wb, bias = params["wc"], params["wb"], params["bias"]
    n_cls, n_bbox = params["n_cls"], params["n_bbox"]
    ncls_pad, nbbox_pad = wc.shape[1], wb.shape[1]
    compute_dtype = params["compute_dtype"]
    w_itemsize = jnp.dtype(compute_dtype).itemsize

    # --- Per-generation VMEM-aware B tiling ----------------------------------
    vmem_limit, budget = _vmem_budget_bytes()
    resident = (C * ncls_pad + C * nbbox_pad) * w_itemsize + nbbox_pad * 4
    per_row = 2 * C * 4 + 2 * (ncls_pad + nbbox_pad) * 4     # dbl-buffered x + outs
    avail = budget - resident
    # TODO(synk): if `avail` goes non-positive for very large C, add a trailing
    # "arbitrary" K grid axis with an f32 VMEM accumulator instead of keeping
    # the whole (C, n_pad) weight slabs resident.
    tb_cap = max(8, min(1024, (max(avail, per_row * 8) // per_row) // 8 * 8))

    # Minimize batch-padding waste: split B as evenly as possible into tiles
    # no larger than tb_cap, each rounded up to a multiple of 8 sublanes.
    n_tiles = max(1, _cdiv(B, tb_cap))
    tb = _round_up(_cdiv(B, n_tiles), 8)
    b_pad = _round_up(B, tb)
    x_p = x2d if b_pad == B else jnp.pad(x2d, ((0, b_pad - B), (0, 0)))
    grid = (b_pad // tb,)
    # TODO(synk): for tiny B on v7x (single grid step) add a second "parallel"
    # column grid axis over the padded output widths so both TensorCores work.

    cost = pl.CostEstimate(
        flops=2 * b_pad * C * (ncls_pad + nbbox_pad)
              + 2 * b_pad * C + 2 * b_pad * (ncls_pad + nbbox_pad),
        transcendentals=2 * b_pad,
        bytes_accessed=4 * b_pad * C + resident
                       + 4 * b_pad * (ncls_pad + nbbox_pad))

    kernel = functools.partial(_cosine_predictor_kernel,
                               compute_dtype=compute_dtype)

    out_s, out_b = pl.pallas_call(
        kernel,
        out_shape=(jax.ShapeDtypeStruct((b_pad, ncls_pad), jnp.float32),
                   jax.ShapeDtypeStruct((b_pad, nbbox_pad), jnp.float32)),
        grid_spec=pltpu.PrefetchScalarGridSpec(
            num_scalar_prefetch=0,
            grid=grid,
            in_specs=[
                pl.BlockSpec((tb, C), lambda i: (i, 0)),   # x tile (f32, pipelined)
                _resident_spec((C, ncls_pad)),             # cls weights (bf16, resident)
                _resident_spec((C, nbbox_pad)),            # bbox weights (bf16, resident)
                _resident_spec((1, nbbox_pad)),            # bbox bias (f32, resident)
            ],
            out_specs=[
                pl.BlockSpec((tb, ncls_pad), lambda i: (i, 0)),
                pl.BlockSpec((tb, nbbox_pad), lambda i: (i, 0)),
            ],
        ),
        compiler_params=pltpu.CompilerParams(
            dimension_semantics=("parallel",),   # shard B across v7x TCs
            vmem_limit_bytes=vmem_limit),
        cost_estimate=cost,
    )(x_p, wc, wb, bias)

    # Contiguous leading slices (skipped entirely when no padding was added).
    scores = out_s if (b_pad == B and ncls_pad == n_cls) else out_s[:B, :n_cls]
    bbox_deltas = out_b if (b_pad == B and nbbox_pad == n_bbox) else out_b[:B, :n_bbox]
    return scores, bbox_deltas


def cosine_similarity_predictor(x, cls_weight, bbox_weight, bbox_bias, scale):
    """Convenience wrapper: per-call weight prep + forward (prefer hoisting the
    prep via prepare_cosine_predictor_params when weights are reused)."""
    params = prepare_cosine_predictor_params(cls_weight, bbox_weight, bbox_bias, scale)
    return cosine_similarity_predictor_forward(x, params)


def init_params(key, in_channels, num_classes, scale=COSINE_SCALE):
    k1, k2 = jax.random.split(key)
    cls_weight = 0.01 * jax.random.normal(k1, (num_classes, in_channels), jnp.float32)
    bbox_weight = 0.001 * jax.random.normal(k2, (num_classes * 4, in_channels), jnp.float32)
    bbox_bias = jnp.zeros((num_classes * 4,), jnp.float32)
    scale_param = jnp.asarray(scale, jnp.float32)
    return cls_weight, bbox_weight, bbox_bias, scale_param


def _reference(x, cls_w, bbox_w, bbox_b, scale):
    x2d = x.reshape(x.shape[0], -1)
    xn = jnp.linalg.norm(x2d, axis=1, keepdims=True)
    xnm = x2d / (xn + 1e-5)
    wn = jnp.linalg.norm(cls_w, axis=1, keepdims=True)
    wnm = cls_w / (wn + 1e-5)
    ref_scores = scale * (xnm @ wnm.T)
    ref_bbox = x2d @ bbox_w.T + bbox_b
    return ref_scores, ref_bbox


if __name__ == "__main__":
    key = jax.random.PRNGKey(0)
    kx, kp, kb, kx2 = jax.random.split(key, 4)

    B, C, num_classes = 2, 32, 8
    # Input mimics the NCHW (B, C, 1, 1) case handled by the module.
    x = jax.random.normal(kx, (B, C, 1, 1), jnp.float32)
    cls_w, bbox_w, bbox_b, scale = init_params(kp, C, num_classes)

    # Hoisted weight prep (done once), reused across forward calls.
    params = prepare_cosine_predictor_params(cls_w, bbox_w, bbox_b, scale)

    scores, bbox_deltas = cosine_similarity_predictor_forward(x, params)
    jax.block_until_ready((scores, bbox_deltas))

    ref_scores, ref_bbox = _reference(x, cls_w, bbox_w, bbox_b, scale)
    assert scores.shape == (B, num_classes)
    assert bbox_deltas.shape == (B, num_classes * 4)
    # bf16 MXU operands -> loosened tolerances (scores bounded by the cosine scale).
    assert jnp.allclose(scores, ref_scores, atol=5e-2, rtol=2e-2)
    assert jnp.allclose(bbox_deltas, ref_bbox, atol=2e-3, rtol=2e-2)

    # Second check: non-zero bias, (B, C) input, exercises the bias-add path.
    bbox_b2 = 0.1 * jax.random.normal(kb, (num_classes * 4,), jnp.float32)
    params2 = prepare_cosine_predictor_params(cls_w, bbox_w, bbox_b2, scale)
    s2, bd2 = cosine_similarity_predictor_forward(x.reshape(B, C), params2)
    jax.block_until_ready((s2, bd2))
    ref_s2, ref_bd2 = _reference(x, cls_w, bbox_w, bbox_b2, scale)
    assert jnp.allclose(s2, ref_s2, atol=5e-2, rtol=2e-2)
    assert jnp.allclose(bd2, ref_bd2, atol=2e-3, rtol=2e-2)

    # Third check: B not a multiple of 8 exercises the row-padding path.
    B3 = 20
    x3 = jax.random.normal(kx2, (B3, C), jnp.float32)
    s3, bd3 = cosine_similarity_predictor_forward(x3, params2)
    jax.block_until_ready((s3, bd3))
    ref_s3, ref_bd3 = _reference(x3, cls_w, bbox_w, bbox_b2, scale)
    assert s3.shape == (B3, num_classes) and bd3.shape == (B3, num_classes * 4)
    assert jnp.allclose(s3, ref_s3, atol=5e-2, rtol=2e-2)
    assert jnp.allclose(bd3, ref_bd3, atol=2e-3, rtol=2e-2)

    print("KERNEL_OK")
</pallas_src>

<mosaic_0001>
module attributes {stable_mosaic.version = 11 : i64} {
  func.func @_cosine_predictor_kernel(%arg0: i32, %arg1: memref<8x32xf32, #tpu.memory_space<vmem>>, %arg2: memref<32x128xbf16, #tpu.memory_space<vmem>>, %arg3: memref<32x128xbf16, #tpu.memory_space<vmem>>, %arg4: memref<1x128xf32, #tpu.memory_space<vmem>>, %arg5: memref<8x128xf32, #tpu.memory_space<vmem>>, %arg6: memref<8x128xf32, #tpu.memory_space<vmem>>) attributes {dimension_semantics = [#tpu.dimension_semantics<parallel>], iteration_bounds = array<i64: 1>, scalar_prefetch = 0 : i64, scratch_operands = 0 : i64, tpu.core_type = #tpu.core_type<tc>, window_params = [{transform_indices = @transform_0, window_bounds = array<i64: 8, 32>}, {pipeline_mode = #tpu.pipeline_mode<synchronous>, transform_indices = @transform_1, window_bounds = array<i64: 32, 128>}, {pipeline_mode = #tpu.pipeline_mode<synchronous>, transform_indices = @transform_2, window_bounds = array<i64: 32, 128>}, {pipeline_mode = #tpu.pipeline_mode<synchronous>, transform_indices = @transform_3, window_bounds = array<i64: 1, 128>}, {transform_indices = @transform_4, window_bounds = array<i64: 8, 128>}, {transform_indices = @transform_5, window_bounds = array<i64: 8, 128>}]} {
    %c0 = arith.constant 0 : index
    %c0_0 = arith.constant 0 : index
    %0 = vector.load %arg1[%c0, %c0_0] : memref<8x32xf32, #tpu.memory_space<vmem>>, vector<8x32xf32>
    %1 = arith.mulf %0, %0 : vector<8x32xf32>
    %cst = arith.constant dense<0.000000e+00> : vector<8xf32>
    %2 = vector.multi_reduction <add>, %1, %cst [1] : vector<8x32xf32> to vector<8xf32>
    %3 = vector.shape_cast %2 : vector<8xf32> to vector<8x1xf32>
    %4 = math.sqrt %3 : vector<8x1xf32>
    %cst_1 = arith.constant 9.99999974E-6 : f32
    %5 = vector.broadcast %cst_1 : f32 to vector<8x1xf32>
    %6 = arith.addf %4, %5 : vector<8x1xf32>
    %7 = tpu.reciprocal %6 : vector<8x1xf32> -> vector<8x1xf32>
    %8 = arith.truncf %0 : vector<8x32xf32> to vector<8x32xbf16>
    %c0_2 = arith.constant 0 : index
    %c0_3 = arith.constant 0 : index
    %9 = vector.load %arg2[%c0_2, %c0_3] : memref<32x128xbf16, #tpu.memory_space<vmem>>, vector<32x128xbf16>
    %cst_4 = arith.constant dense<0.000000e+00> : vector<8x128xf32>
    %10 = tpu.matmul %8, %9, %cst_4 {dimension_numbers = #tpu.dot_dimension_numbers<[1], [0], [0], [1], [0, 0, 1, 1], [], []>} : vector<8x32xbf16>, vector<32x128xbf16>, vector<8x128xf32> -> vector<8x128xf32>
    %11 = vector.broadcast %7 : vector<8x1xf32> to vector<8x128xf32>
    %12 = arith.mulf %10, %11 : vector<8x128xf32>
    %c0_5 = arith.constant 0 : index
    %c0_6 = arith.constant 0 : index
    %13 = vector.load %arg5[%c0_5, %c0_6] : memref<8x128xf32, #tpu.memory_space<vmem>>, vector<8x128xf32>
    tpu.vector_store %arg5[%c0_5, %c0_6], %12 {strides = array<i32>} : memref<8x128xf32, #tpu.memory_space<vmem>>, vector<8x128xf32>,
    %c0_7 = arith.constant 0 : index
    %c0_8 = arith.constant 0 : index
    %14 = vector.load %arg3[%c0_7, %c0_8] : memref<32x128xbf16, #tpu.memory_space<vmem>>, vector<32x128xbf16>
    %cst_9 = arith.constant dense<0.000000e+00> : vector<8x128xf32>
    %15 = tpu.matmul %8, %14, %cst_9 {dimension_numbers = #tpu.dot_dimension_numbers<[1], [0], [0], [1], [0, 0, 1, 1], [], []>} : vector<8x32xbf16>, vector<32x128xbf16>, vector<8x128xf32> -> vector<8x128xf32>
    %c0_10 = arith.constant 0 : index
    %c0_11 = arith.constant 0 : index
    %16 = vector.load %arg4[%c0_10, %c0_11] : memref<1x128xf32, #tpu.memory_space<vmem>>, vector<1x128xf32>
    %17 = vector.broadcast %16 : vector<1x128xf32> to vector<8x128xf32>
    %18 = arith.addf %15, %17 : vector<8x128xf32>
    %c0_12 = arith.constant 0 : index
    %c0_13 = arith.constant 0 : index
    %19 = vector.load %arg6[%c0_12, %c0_13] : memref<8x128xf32, #tpu.memory_space<vmem>>, vector<8x128xf32>
    tpu.vector_store %arg6[%c0_12, %c0_13], %18 {strides = array<i32>} : memref<8x128xf32, #tpu.memory_space<vmem>>, vector<8x128xf32>,
    return
  }
  func.func @transform_0(%arg0: i32) -> (i32, i32) {
    %c0_i32 = arith.constant 0 : i32
    %c0_i32_0 = arith.constant 0 : i32
    return %arg0, %c0_i32 : i32, i32
  }
  func.func @transform_1(%arg0: i32) -> (i32, i32) {
    %c0_i32 = arith.constant 0 : i32
    %c0_i32_0 = arith.constant 0 : i32
    %c0_i32_1 = arith.constant 0 : i32
    return %c0_i32, %c0_i32_0 : i32, i32
  }
  func.func @transform_2(%arg0: i32) -> (i32, i32) {
    %c0_i32 = arith.constant 0 : i32
    %c0_i32_0 = arith.constant 0 : i32
    %c0_i32_1 = arith.constant 0 : i32
    return %c0_i32, %c0_i32_0 : i32, i32
  }
  func.func @transform_3(%arg0: i32) -> (i32, i32) {
    %c0_i32 = arith.constant 0 : i32
    %c0_i32_0 = arith.constant 0 : i32
    %c0_i32_1 = arith.constant 0 : i32
    return %c0_i32, %c0_i32_0 : i32, i32
  }
  func.func @transform_4(%arg0: i32) -> (i32, i32) {
    %c0_i32 = arith.constant 0 : i32
    %c0_i32_0 = arith.constant 0 : i32
    return %arg0, %c0_i32 : i32, i32
  }
  func.func @transform_5(%arg0: i32) -> (i32, i32) {
    %c0_i32 = arith.constant 0 : i32
    %c0_i32_0 = arith.constant 0 : i32
    return %arg0, %c0_i32 : i32, i32
  }
}

</mosaic_0001>

<bundles_post_ra>
// kernel: tpu_custom_call.1
= control target key start
LH: loop header
LB: loop body
LE: loop exit
PB: predicated region body
PF: predicated region fallthrough
CT: control target
= control target key end

     0   :  { %11 = vsyncpa [#allocation3], 0  ;;  %s420_s0 = inlined_call_operand.hbm [shape: f32[8,32], index: 0, kind: input, shape index: {}]   ;;  %s421_s1 = inlined_call_operand.hbm [shape: bf16[32,128], index: 1, kind: input, shape index: {}]   ;;  %s422_s2 = inlined_call_operand.hbm [shape: bf16[32,128], index: 2, kind: input, shape index: {}]   ;;  %s423_s3 = inlined_call_operand.vmem [shape: f32[1,128], index: 3, kind: input, shape index: {}]   ;;  %s424_s4 = inlined_call_operand.hbm [shape: f32[8,128], index: 4, kind: output, shape index: {0}]   ;;  %s425_s5 = inlined_call_operand.hbm [shape: f32[8,128], index: 5, kind: output, shape index: {1}]  }
   0x1   :  { %12 = vsyncpa [#allocation6], 0 }
   0x2   :  { %13 = vsyncpa [#allocation4], 0  ;;  %s30_s20 = sshll.u32 %s421_s1, 4  ;;  %s31_s20 = int_to_ptr.hbm [resolvable:$true] %s30_s20 }
   0x3   :  { %14 = vsyncpa [#allocation10], 0  ;;  %s365_s21 = smov [#allocation5]   ;;  %s20_s25 = sshll.u32 %s420_s0, 4  ;;  %s21_s25 = int_to_ptr.hbm [resolvable:$true] %s20_s25 }
   0x4   :  { %s32_s22 = sshll.u32 %s365_s21, 4  ;;  %s366_s26 = smov 64   ;;  %s33_s22 = int_to_ptr.vmem [resolvable:$true] %s32_s22 }
   0x5   :  { %s367_s27 = smov 4   ;;  %s368_s28 = smov [#allocation2]  }
   0x6   :  { %38 = dma.hbm_to_vmem [thread:$0]  %s31_s20, 256, %s33_s22, [#allocation6], %s366_s26, %s366_s26, %s367_s27  }
   0x7   :  { %s22_s29 = sshll.u32 %s368_s28, 4  ;;  %s43_s7 = sshll.u32 %s422_s2, 4  ;;  %s23_s29 = int_to_ptr.vmem [resolvable:$true] %s22_s29  ;;  %s44_s7 = int_to_ptr.hbm [resolvable:$true] %s43_s7 }
   0x8   :  { %25 = dma.hbm_to_vmem [thread:$0]  %s21_s25, 128, %s23_s29, [#allocation3]  }
   0x9   :  { %s369_s1 = smov [#allocation7]  }
   0xa   :  { %s45_s8 = sshll.u32 %s369_s1, 4  ;;  %s46_s8 = int_to_ptr.vmem [resolvable:$true] %s45_s8 }
   0xb   :  { %51 = dma.hbm_to_vmem [thread:$0]  %s44_s7, 256, %s46_s8, [#allocation6], %s366_s26, %s366_s26, %s367_s27  }
   0xc   :  { %357 = dma.done.wait [#allocation3], 128  }
   0xd   :  { %358 = vsyncadd [#allocation3], 4294967168 }
   0xe   :  { %359 = dma.done.wait [#allocation6], 512  }
   0xf   :  { %360 = vsyncadd [#allocation6], 4294966784  ;;  %v67_v0 = vld [vmem:[#allocation2] sm:$0xff]  ;;  %vm69_vm0 = vcmask 261120   ;;  %v222_v1 = vld [vmem:[#allocation5 + $0x8] sm:$0xff]  ;;  %s370_s9 = smov [#allocation9]  }
  0x10   :  { %v224_v2 = vld [vmem:[#allocation7 + $0x8] sm:$0xff]  ;;  %v68_v3 = vmul.f32 %v67_v0, %v67_v0  ;;  %126 = vmatpush.bf16.msra.mxu0 %v222_v1  ;;  %v221_v4 = vld [vmem:[#allocation5] sm:$0xff]  ;;  %v223_v5 = vld [vmem:[#allocation7] sm:$0xff]  ;;  %v100_v7 = vpack.c.bf16 %v67_v0, %v67_v0  ;;  %s185_s10 = sshll.u32 %s370_s9, 4  ;;  %s187_s13 = sshll.u32 %s425_s5, 4  ;;  %s186_s10 = int_to_ptr.vmem [resolvable:$true] %s185_s10  ;;  %s188_s13 = int_to_ptr.hbm [resolvable:$true] %s187_s13 }
  0x11   :  { %161 = vmatpush.bf16.msra.mxu1 %v224_v2  ;;  %v232_v13 = vld [vmem:[%s423_s3] ss:$0 sm:$0xff]  ;;  %s371_s3 = smov [#allocation8]   ;;  %s176_s16 = sshll.u32 %s424_s4, 4  ;;  %s177_s16 = int_to_ptr.hbm [resolvable:$true] %s176_s16 }
  0x12   :  { %v70_v6 = vsel %vm69_vm0, %v68_v3, 0.0  ;;  %s174_s5 = sshll.u32 %s371_s3, 4  ;;  %s175_s5 = int_to_ptr.vmem [resolvable:$true] %s174_s5 }
  0x13   :  { %71 = vadd.xlane.f32.xlu0 %v70_v6 }
  0x14   :  { %127 = vmatpush.bf16.msra.mxu0 %v221_v4 }
  0x15   :  { %162 = vmatpush.bf16.msra.mxu1 %v223_v5 }
  0x17   :  { %211 = vmatmul.msk.bf16.vlgmr.msra.gmra.mxu0 %vm69_vm0, %v100_v7 }
  0x18   :  { %220 = vmatmul.msk.bf16.vlgmr.msra.gmra.mxu1 %vm69_vm0, %v100_v7 }
  0x86   :  { %v72_v8 = vpop.xlane.xlu0 %71 }
  0x87   :  { %233 = vrsqrt.f32 %v72_v8  ;;  %vm80_vm1 = vcmp.eq.f32.partialorder %v72_v8, inf  ;;  %v83_v20 = vand.u32 2147483648, %v72_v8  ;;  %vm82_vm2 = vcmp.eq.f32.partialorder %v72_v8, 0.0 }
  0x8d   :  { %v234_v9 = vpop.eup %233 }
  0x8e   :  { %v74_v10 = vmul.f32 %v234_v9, %v72_v8 }
  0x90   :  { %v75_v11 = vmul.f32 %v234_v9, %v74_v10 }
  0x92   :  { %v76_v12 = vmul.f32 0.5, %v75_v11 }
  0x94   :  { %v77_v14 = vsub.f32 1.5, %v76_v12  ;;  %v129_v15 = vpop.f32.mrf.mxu0 }
  0x95   :  { %v164_v16 = vpop.f32.mrf.mxu1 }
  0x96   :  { %v78_v17 = vmul.f32 %v234_v9, %v77_v14  ;;  %v165_v18 = vadd.f32 %v232_v13, %v164_v16 }
  0x98   :  { %v79_v19 = vmul.f32 %v78_v17, %v72_v8  ;;  %168 = vst [vmem:[#allocation9] sm:$0xff] %v165_v18 }
  0x99   :  { %190 = dma.vmem_to_hbm [thread:$0]  %s186_s10, 128, %s188_s13, [#allocation10]  }
  0x9a   :  { %v81_v21 = vsel %vm80_vm1, %v72_v8, %v79_v19 }
  0x9b   :  { %v84_v22 = vsel %vm82_vm2, %v83_v20, %v81_v21 }
  0x9c   :  { %v85_v23 = vadd.f32 1e-05, %v84_v22  ;;  %v131_v24 = vpop.f32.mrf.mxu0 }
  0x9d   :  { %v166_v25 = vpop.f32.mrf.mxu1 }
  0x9e   :  { %235 = vrcp.f32 %v85_v23  ;;  %v97_v29 = vand.u32 2147483648, %v85_v23  ;;  %v95_v31 = vand.u32 2147483647, %v85_v23  ;;  %vm91_vm4 = vweird.f32 %v85_v23 }
  0xa0   :  { %v98_v33 = vor.u32 1.1754944e-38, %v97_v29  ;;  %vm96_vm6 = vcmp.eq.f32.partialorder %v95_v31, 8.507059e+37 }
  0xa4   :  { %v236_v26 = vpop.eup %235 }
  0xa5   :  { %v87_v27 = vmul.f32 %v236_v26, %v85_v23  ;;  %vm92_vm3 = vweird.f32 %v236_v26 }
  0xa6   :  { %vm93_vm5 = vmor %vm91_vm4, %vm92_vm3 }
  0xa7   :  { %v88_v28 = vsub.f32 1.0, %v87_v27 }
  0xa9   :  { %v89_v30 = vmul.f32 %v236_v26, %v88_v28 }
  0xab   :  { %v90_v32 = vadd.f32 %v236_v26, %v89_v30 }
  0xad   :  { %v94_v34 = vsel %vm93_vm5, %v236_v26, %v90_v32 }
  0xae   :  { %v99_v35 = vsel %vm96_vm6, %v98_v33, %v94_v34 }
  0xaf   :  { %v133_v36 = vmul.f32 %v129_v15, %v99_v35 }
  0xb1   :  { %134 = vst [vmem:[#allocation8] sm:$0xff] %v133_v36 }
  0xb2   :  { %179 = dma.vmem_to_hbm [thread:$0]  %s175_s5, 128, %s177_s16, [#allocation4]  }
  0xb3   :  { %361 = dma.done.wait [#allocation4], 128  }
  0xb4   :  { %362 = vsyncadd [#allocation4], 4294967168 }
  0xb5   :  { %363 = dma.done.wait [#allocation10], 128  }
  0xb6   :  { %364 = vsyncadd [#allocation10], 4294967168 }
  0xb7   :  { %199 = vsyncpa [#allocation3], 1 }
  0xb8   :  { %200 = vsyncpa [#allocation6], 1 }
  0xb9   :  { %201 = vsyncpa [#allocation4], 1 }
  0xba   :  { %202 = vsyncpa [#allocation10], 1 }

</bundles_post_ra>
